<compile_context>
chip_gen: v6e
topology: v6e:2x2x1
jax: 0.10.0
libtpu: 0.0.40
codegen_flags: <defaults>
</compile_context>

<pallas_src>
import jax
import jax.numpy as jnp
from jax.experimental import pallas as pl
from jax.experimental.pallas import tpu as pltpu

# Per-tile byte budget.  With BlockSpec double buffering (2 input + 2 output
# buffers) the resident footprint is ~4x this, i.e. ~16 MiB: inside the 32 MiB
# scoped-VMEM limit we request below and well under every generation's
# physical VMEM (v7x: 64 MiB).
_TILE_BUDGET_BYTES = 4 * 1024 * 1024
_VMEM_LIMIT_BYTES = 32 * 1024 * 1024


def _round_down(v: int, m: int) -> int:
    return (v // m) * m


def _chomp_kernel(x_ref, o_ref):
    l_out = o_ref.shape[-1]
    if l_out == x_ref.shape[-1]:
        # Lane-tiled path: input and output tiles are identical -> plain copy.
        o_ref[...] = x_ref[...]
    else:
        # Small-L fallback: block spans the full length axis; chomp in-body.
        o_ref[...] = x_ref[:, :l_out]


def chomp1d(x: jax.Array, chomp_size: int) -> jax.Array:
    """Pallas equivalent of Chomp1d: drop the trailing `chomp_size` timesteps."""
    n, c, l = x.shape
    assert 0 < chomp_size < l, "chomp_size must be in (0, L)"
    l_out = l - chomp_size

    # Collapse batch x channel onto the sublane axis (free for NCL-contiguous).
    r = n * c
    x2 = x.reshape(r, l)

    itemsize = jnp.dtype(x.dtype).itemsize
    # Sublane granularity: 8 rows for 32-bit dtypes, 16 for 16-bit, 32 for 8-bit.
    sub = 8 * max(1, 4 // itemsize)

    if l_out >= 128:
        full_rows = _TILE_BUDGET_BYTES // (l_out * itemsize)
        if l_out % 128 == 0 and full_rows >= sub:
            # Full-length lane tile: unmasked lane-dense stores, fully
            # contiguous per-row DMAs, chomped tail never read.
            tl = l_out
            tr = r if r <= full_rows else _round_down(full_rows, sub)
        else:
            # Multiple-of-128 lane tiles covering only the first l_out columns.
            tr = r if r <= 512 else 512
            cap = min(_round_down(l_out, 128),
                      _round_down(_TILE_BUDGET_BYTES // (tr * itemsize), 128))
            cap = max(cap, 128)
            tl = cap
            if l_out % 128 == 0:
                # Prefer a lane tile that divides l_out: no masked final tile,
                # no redundant fetch of the chomped tail.
                for cand in range(cap, 127, -128):
                    if l_out % cand == 0:
                        tl = cand
                        break
        grid = (pl.cdiv(r, tr), pl.cdiv(l_out, tl))
        in_spec = pl.BlockSpec((tr, tl), lambda i, j: (i, j))
        out_spec = pl.BlockSpec((tr, tl), lambda i, j: (i, j))
        dims = ("parallel", "parallel")
    else:
        # L too small to lane-tile: full-extent length blocks (block dims equal
        # to array dims satisfy the (8,128) rule), slice in-kernel, and grow
        # the row tile toward the byte budget to amortize per-step overhead.
        max_tr = _TILE_BUDGET_BYTES // (l * itemsize)
        tr = r if r <= max_tr else max(_round_down(max_tr, sub), sub)
        grid = (pl.cdiv(r, tr),)
        in_spec = pl.BlockSpec((tr, l), lambda i: (i, 0))
        out_spec = pl.BlockSpec((tr, l_out), lambda i: (i, 0))
        dims = ("parallel",)

    out2 = pl.pallas_call(
        _chomp_kernel,
        out_shape=jax.ShapeDtypeStruct((r, l_out), x.dtype),
        grid_spec=pltpu.PrefetchScalarGridSpec(
            num_scalar_prefetch=0,
            grid=grid,
            in_specs=[in_spec],
            out_specs=out_spec,
        ),
        compiler_params=pltpu.CompilerParams(
            dimension_semantics=dims,
            vmem_limit_bytes=_VMEM_LIMIT_BYTES,
        ),
    )(x2)

    return out2.reshape(n, c, l_out)


if __name__ == "__main__":
    key = jax.random.PRNGKey(0)
    k1, k2, k3 = jax.random.split(key, 3)

    # Case 1: tiny shape typical of the module's unit tests
    # (exercises the small-L fallback path with the in-body slice).
    n1, c1, l1, ch1 = 2, 4, 16, 3
    x1 = jax.random.normal(k1, (n1, c1, l1), dtype=jnp.float32)
    out1 = jax.block_until_ready(chomp1d(x1, ch1))
    ref1 = x1[:, :, :-ch1]
    assert out1.shape == (n1, c1, l1 - ch1)
    assert jnp.array_equal(out1, ref1)

    # Case 2: longer sequence with l_out not a multiple of 128
    # (exercises the lane-tiled path: multi-block grid, partial final lane
    #  tile with masked output stores and OOB-padded input block).
    n2, c2, l2, ch2 = 2, 8, 512, 64
    x2 = jax.random.normal(k2, (n2, c2, l2), dtype=jnp.float32)
    out2 = jax.block_until_ready(chomp1d(x2, ch2))
    ref2 = x2[:, :, :-ch2]
    assert out2.shape == (n2, c2, l2 - ch2)
    assert jnp.array_equal(out2, ref2)

    # Case 3: l_out a multiple of 128
    # (exercises the full-length lane tile: unmasked, fully contiguous copies).
    n3, c3, l3, ch3 = 2, 4, 300, 44
    x3 = jax.random.normal(k3, (n3, c3, l3), dtype=jnp.float32)
    out3 = jax.block_until_ready(chomp1d(x3, ch3))
    ref3 = x3[:, :, :-ch3]
    assert out3.shape == (n3, c3, l3 - ch3)
    assert jnp.array_equal(out3, ref3)

    print("KERNEL_OK")
</pallas_src>

<mosaic_0001>
module attributes {stable_mosaic.version = 11 : i64} {
  func.func @_chomp_kernel(%arg0: i32, %arg1: memref<8x16xf32, #tpu.memory_space<vmem>>, %arg2: memref<8x13xf32, #tpu.memory_space<vmem>>) attributes {dimension_semantics = [#tpu.dimension_semantics<parallel>], iteration_bounds = array<i64: 1>, scalar_prefetch = 0 : i64, scratch_operands = 0 : i64, tpu.core_type = #tpu.core_type<tc>, window_params = [{transform_indices = @transform_0, window_bounds = array<i64: 8, 16>}, {transform_indices = @transform_1, window_bounds = array<i64: 8, 13>}]} {
    %c0 = arith.constant 0 : index
    %c0_0 = arith.constant 0 : index
    %0 = vector.load %arg1[%c0, %c0_0] : memref<8x16xf32, #tpu.memory_space<vmem>>, vector<8x13xf32>
    %c0_1 = arith.constant 0 : index
    %c0_2 = arith.constant 0 : index
    %1 = vector.load %arg2[%c0_1, %c0_2] : memref<8x13xf32, #tpu.memory_space<vmem>>, vector<8x13xf32>
    tpu.vector_store %arg2[%c0_1, %c0_2], %0 {strides = array<i32>} : memref<8x13xf32, #tpu.memory_space<vmem>>, vector<8x13xf32>,
    return
  }
  func.func @transform_0(%arg0: i32) -> (i32, i32) {
    %c0_i32 = arith.constant 0 : i32
    %c0_i32_0 = arith.constant 0 : i32
    return %arg0, %c0_i32 : i32, i32
  }
  func.func @transform_1(%arg0: i32) -> (i32, i32) {
    %c0_i32 = arith.constant 0 : i32
    %c0_i32_0 = arith.constant 0 : i32
    return %arg0, %c0_i32 : i32, i32
  }
}

</mosaic_0001>

<bundles_post_ra>
// kernel: tpu_custom_call.1
= control target key start
LH: loop header
LB: loop body
LE: loop exit
PB: predicated region body
PF: predicated region fallthrough
CT: control target
= control target key end

     0   :  { %6 = vsyncpa [#allocation3], 0  ;;  %s103_s0 = inlined_call_operand.hbm [shape: f32[8,16], index: 0, kind: input, shape index: {}]   ;;  %s104_s1 = inlined_call_operand.hbm [shape: f32[8,13], index: 1, kind: output, shape index: {}]  }
   0x1   :  { %7 = vsyncpa [#allocation4], 0  ;;  %s85_s6 = smov [#allocation2]  }
   0x2   :  { %s14_s7 = sshll.u32 %s85_s6, 4  ;;  %s15_s7 = int_to_ptr.vmem [resolvable:$true] %s14_s7 }
   0x3   :  { %s49_s8 = scalar_lea.vmem %s15_s7, 128  ;;  %p54_p1 = scmp.lt.s32.totalorder %s15_s7, %s15_s7 }
   0x4   :  { %p50_p0 = scmp.ne.s32.totalorder %s15_s7, %s49_s8  ;;  %p55_p2 = scmp.lt.s32.totalorder %s49_s8, %s49_s8 }
   0x6   :  { %p56_p3 = por %p55_p2, %p54_p1 }
   0x8   :  { %p57_p4 = pnand %p56_p3, %p50_p0 }
   0xa   :  { %60 = shalt.err (!%p57_p4)
}
   0xb   :  { %17 = dma.hbm_to_vmem [thread:$0]  %s103_s0, 128, %s15_s7, [#allocation3]  }
   0xc   :  { %81 = dma.done.wait [#allocation3], 128  }
   0xd   :  { %82 = vsyncadd [#allocation3], 4294967168  ;;  %s86_s11 = smov [#allocation5]   ;;  %vm22_vm0 = vcmask 105472   ;;  %v21_v0 = vld [vmem:[#allocation2] sm:$0xff] }
   0xe   :  { %s30_s12 = sshll.u32 %s86_s11, 4  ;;  %23 = vst.msk [vmem:[#allocation5] sm:$0xff] %vm22_vm0, %v21_v0  ;;  %s31_s12 = int_to_ptr.vmem [resolvable:$true] %s30_s12 }
   0xf   :  { %s61_s13 = scalar_lea.vmem %s31_s12, 128  ;;  %p66_p6 = scmp.lt.s32.totalorder %s31_s12, %s31_s12 }
  0x10   :  { %p62_p5 = scmp.ne.s32.totalorder %s31_s12, %s61_s13  ;;  %p67_p7 = scmp.lt.s32.totalorder %s61_s13, %s61_s13 }
  0x12   :  { %p68_p8 = por %p67_p7, %p66_p6 }
  0x14   :  { %p69_p9 = pnand %p68_p8, %p62_p5 }
  0x16   :  { %72 = shalt.err (!%p69_p9)
}
  0x17   :  { %33 = dma.vmem_to_hbm [thread:$0]  %s31_s12, 128, %s104_s1, [#allocation4]  }
  0x18   :  { %83 = dma.done.wait [#allocation4], 128  }
  0x19   :  { %84 = vsyncadd [#allocation4], 4294967168 }
  0x1a   :  { %37 = vsyncpa [#allocation3], 1 }
  0x1b   :  { %38 = vsyncpa [#allocation4], 1 }

</bundles_post_ra>
